<compile_context>
chip_gen: v7x
topology: tpu7x:2x2x1
jax: 0.10.0
libtpu: 0.0.40
codegen_flags: <defaults>
</compile_context>

<pallas_src>
import functools

import jax
import jax.numpy as jnp
from jax.experimental import pallas as pl
from jax.experimental.pallas import tpu as pltpu

HIDDEN = 64  # hidden width of the module (unpadded: it never touches HBM)


def _device_kind() -> str:
    try:
        return jax.devices()[0].device_kind.lower()
    except Exception:  # pragma: no cover
        return ""


def _default_bf16_act() -> bool:
    # bf16 VPU/EUP exist on v6e/v7x; v5e (and older) need the f32 elementwise path.
    kind = _device_kind()
    return ("v6" in kind) or ("v7" in kind) or ("7x" in kind)


def _mlp_q(x_ref, w1_ref, b1_ref, w2_ref, b2_ref, *, bf16_act):
    """Fused 2-layer MLP: bf16 MXU operands, f32 accumulation.

    Bias-add + tanh run in bf16 on chips with bf16 VPU/EUP (v6e/v7x) and in
    f32 otherwise (v5e-safe).
    """
    x = x_ref[...].astype(jnp.bfloat16)
    h = jnp.dot(x, w1_ref[...], preferred_element_type=jnp.float32)   # (tb, 64) f32
    if bf16_act:
        h = jnp.tanh((h + b1_ref[...]).astype(jnp.bfloat16))          # bf16 VPU/EUP
    else:
        h = jnp.tanh(h + b1_ref[...]).astype(jnp.bfloat16)            # f32 path
    q = jnp.dot(h, w2_ref[...], preferred_element_type=jnp.float32)   # (tb, A) f32
    return q + b2_ref[...]


def mlp_kernel(x_ref, w1_ref, b1_ref, w2_ref, b2_ref, o_ref, *, bf16_act):
    o_ref[...] = _mlp_q(x_ref, w1_ref, b1_ref, w2_ref, b2_ref,
                        bf16_act=bf16_act).astype(o_ref.dtype)


def act_kernel(x_ref, w1_ref, b1_ref, w2_ref, b2_ref, a_ref, *, bf16_act):
    """Greedy action per row: q + first-occurrence argmax fused in one kernel."""
    q = _mlp_q(x_ref, w1_ref, b1_ref, w2_ref, b2_ref, bf16_act=bf16_act)  # (tb, A)
    n = q.shape[1]
    lane = jax.lax.broadcasted_iota(jnp.int32, q.shape, 1)
    qmax = jnp.max(q, axis=1, keepdims=True)
    cand = jnp.where(q >= qmax, lane, jnp.int32(n))    # lowest index attaining max
    a_ref[...] = jnp.min(cand, axis=1, keepdims=True)


def _common_specs(tb, F, hidden, n_actions):
    return [
        pl.BlockSpec((tb, F), lambda i: (i, 0)),             # batch-tiled activations
        # grid-invariant weights/biases: stay VMEM-resident across grid steps
        pl.BlockSpec((F, hidden), lambda i: (0, 0)),
        pl.BlockSpec((1, hidden), lambda i: (0, 0)),
        pl.BlockSpec((hidden, n_actions), lambda i: (0, 0)),
        pl.BlockSpec((1, n_actions), lambda i: (0, 0)),
    ]


def _compiler_params(core_parallel):
    dsem = pltpu.CORE_PARALLEL if core_parallel else pltpu.PARALLEL
    return pltpu.CompilerParams(
        dimension_semantics=(dsem,),
        vmem_limit_bytes=32 * 1024 * 1024,   # raises v5e's 16 MiB scoped default
    )


def network_forward(x, params, n_actions, *, block_b=4096, bf16_act=None,
                    core_parallel=False):
    """x: (B, F) float32 -> (B, n_actions) float32 (matches Network.forward)."""
    assert block_b % 8 == 0
    w1, b1, w2, b2 = params
    if bf16_act is None:
        bf16_act = _default_bf16_act()
    x = x.astype(jnp.float32)
    B, F = x.shape
    hidden = w1.shape[1]
    tb = B if B <= block_b else block_b
    nb = pl.cdiv(B, tb)
    return pl.pallas_call(
        functools.partial(mlp_kernel, bf16_act=bf16_act),
        out_shape=jax.ShapeDtypeStruct((B, n_actions), jnp.float32),
        grid=(nb,),
        in_specs=_common_specs(tb, F, hidden, n_actions),
        out_specs=pl.BlockSpec((tb, n_actions), lambda i: (i, 0)),
        compiler_params=_compiler_params(core_parallel),
    )(x, w1, b1, w2, b2)


def act_batch(obs, params, n_actions, *, block_b=4096, bf16_act=None,
              core_parallel=False):
    """obs: (B, F) -> (B,) int32 greedy actions; argmax fused in-kernel
    (no Q-value HBM round trip)."""
    assert block_b % 8 == 0
    w1, b1, w2, b2 = params
    if bf16_act is None:
        bf16_act = _default_bf16_act()
    obs = obs.astype(jnp.float32)
    B, F = obs.shape
    hidden = w1.shape[1]
    tb = B if B <= block_b else block_b
    nb = pl.cdiv(B, tb)
    idx = pl.pallas_call(
        functools.partial(act_kernel, bf16_act=bf16_act),
        out_shape=jax.ShapeDtypeStruct((B, 1), jnp.int32),
        grid=(nb,),
        in_specs=_common_specs(tb, F, hidden, n_actions),
        out_specs=pl.BlockSpec((tb, 1), lambda i: (i, 0)),
        compiler_params=_compiler_params(core_parallel),
    )(obs, w1, b1, w2, b2)
    return idx[:, 0]


def act(obs, params, n_actions, *, bf16_act=None):
    """Mirror of Network.act: greedy action for one observation."""
    obs = jnp.asarray(obs, jnp.float32).reshape(1, -1)
    return act_batch(obs, params, n_actions, bf16_act=bf16_act)[0]


def init_params(key, in_features, n_actions, *, hidden=HIDDEN):
    """torch.nn.Linear default init (U[-1/sqrt(fan_in), +1/sqrt(fan_in)]).

    Weights are stored once in bf16 (MXU operands); biases stay f32.
    Returns (kernel_params, raw_f32_params).
    """
    k1, k2, k3, k4 = jax.random.split(key, 4)
    bound1 = 1.0 / jnp.sqrt(jnp.float32(in_features))
    bound2 = 1.0 / jnp.sqrt(jnp.float32(hidden))
    w1 = jax.random.uniform(k1, (in_features, hidden), jnp.float32, -bound1, bound1)
    b1 = jax.random.uniform(k2, (hidden,), jnp.float32, -bound1, bound1)
    w2 = jax.random.uniform(k3, (hidden, n_actions), jnp.float32, -bound2, bound2)
    b2 = jax.random.uniform(k4, (n_actions,), jnp.float32, -bound2, bound2)
    kernel_params = (w1.astype(jnp.bfloat16), b1.reshape(1, hidden),
                     w2.astype(jnp.bfloat16), b2.reshape(1, n_actions))
    raw = (w1, b1, w2, b2)
    return kernel_params, raw


if __name__ == "__main__":
    IN_FEATURES = 8      # prod(observation_space.shape)
    N_ACTIONS = 5        # action_space.n
    BATCH = 2
    BATCH_BIG = 8192     # 2 even grid steps at block_b=4096
    BATCH_RAGGED = 1000  # exercises edge-clipped last block (block_b=512)

    key = jax.random.PRNGKey(0)
    kx, kb, kr, kp = jax.random.split(key, 4)

    params, raw = init_params(kp, IN_FEATURES, N_ACTIONS)
    w1, b1, w2, b2 = raw
    bf16_act = _default_bf16_act()

    def reference(x):
        # Matches the kernel's MXU / elementwise rounding choices.
        w1f = params[0].astype(jnp.float32)
        w2f = params[2].astype(jnp.float32)
        xb = x.astype(jnp.bfloat16).astype(jnp.float32)
        pre = xb @ w1f + b1[None, :]
        if bf16_act:
            h = jnp.tanh(pre.astype(jnp.bfloat16).astype(jnp.float32))
        else:
            h = jnp.tanh(pre)
        hb = h.astype(jnp.bfloat16).astype(jnp.float32)
        return hb @ w2f + b2[None, :]

    # --- small batch (module-sized) ---
    x = jax.random.normal(kx, (BATCH, IN_FEATURES), jnp.float32)
    q = jax.block_until_ready(network_forward(x, params, N_ACTIONS))
    assert q.shape == (BATCH, N_ACTIONS)
    assert jnp.allclose(q, reference(x), atol=3e-2, rtol=3e-2)
    # loose check against exact f32 semantics of the original nn.Module
    ref_f32 = jnp.tanh(x @ w1 + b1[None, :]) @ w2 + b2[None, :]
    assert jnp.allclose(q, ref_f32, atol=6e-2, rtol=6e-2)

    # --- large batch: 2 even grid steps, weights VMEM-resident across steps ---
    x_big = jax.random.normal(kb, (BATCH_BIG, IN_FEATURES), jnp.float32)
    q_big = jax.block_until_ready(
        network_forward(x_big, params, N_ACTIONS, block_b=4096))
    assert q_big.shape == (BATCH_BIG, N_ACTIONS)
    assert jnp.allclose(q_big, reference(x_big), atol=3e-2, rtol=3e-2)

    # --- ragged batch: last grid block is edge-clipped (rows past B untouched) ---
    x_rag = jax.random.normal(kr, (BATCH_RAGGED, IN_FEATURES), jnp.float32)
    q_rag = jax.block_until_ready(
        network_forward(x_rag, params, N_ACTIONS, block_b=512))
    assert q_rag.shape == (BATCH_RAGGED, N_ACTIONS)
    assert jnp.allclose(q_rag, reference(x_rag), atol=3e-2, rtol=3e-2)

    # --- act(): fused argmax, single observation ---
    action = int(jax.block_until_ready(act(x[0], params, N_ACTIONS)))
    assert 0 <= action < N_ACTIONS
    rq = reference(x[:1])[0]
    assert float(rq[action]) >= float(rq.max()) - 2e-2

    # --- act_batch(): fused argmax over a batch of observations ---
    acts = jax.block_until_ready(act_batch(x_big[:256], params, N_ACTIONS))
    assert acts.shape == (256,)
    ref_q = reference(x_big[:256])
    sel = jnp.take_along_axis(ref_q, acts[:, None].astype(jnp.int32), axis=1)[:, 0]
    assert bool(jnp.all(sel >= ref_q.max(axis=1) - 2e-2))
    assert bool(jnp.all((acts >= 0) & (acts < N_ACTIONS)))

    print("KERNEL_OK")
</pallas_src>

<mosaic_0001>
module attributes {stable_mosaic.version = 11 : i64} {
  func.func @mlp_kernel(%arg0: i32, %arg1: memref<2x8xf32, #tpu.memory_space<vmem>>, %arg2: memref<8x64xbf16, #tpu.memory_space<vmem>>, %arg3: memref<1x64xf32, #tpu.memory_space<vmem>>, %arg4: memref<64x5xbf16, #tpu.memory_space<vmem>>, %arg5: memref<1x5xf32, #tpu.memory_space<vmem>>, %arg6: memref<2x5xf32, #tpu.memory_space<vmem>>) attributes {dimension_semantics = [#tpu.dimension_semantics<parallel>], iteration_bounds = array<i64: 1>, scalar_prefetch = 0 : i64, scratch_operands = 0 : i64, tpu.core_type = #tpu.core_type<tc>, window_params = [{transform_indices = @transform_0, window_bounds = array<i64: 2, 8>}, {pipeline_mode = #tpu.pipeline_mode<synchronous>, transform_indices = @transform_1, window_bounds = array<i64: 8, 64>}, {pipeline_mode = #tpu.pipeline_mode<synchronous>, transform_indices = @transform_2, window_bounds = array<i64: 1, 64>}, {pipeline_mode = #tpu.pipeline_mode<synchronous>, transform_indices = @transform_3, window_bounds = array<i64: 64, 5>}, {pipeline_mode = #tpu.pipeline_mode<synchronous>, transform_indices = @transform_4, window_bounds = array<i64: 1, 5>}, {transform_indices = @transform_5, window_bounds = array<i64: 2, 5>}]} {
    %c0 = arith.constant 0 : index
    %c0_0 = arith.constant 0 : index
    %0 = vector.load %arg1[%c0, %c0_0] : memref<2x8xf32, #tpu.memory_space<vmem>>, vector<2x8xf32>
    %1 = arith.truncf %0 : vector<2x8xf32> to vector<2x8xbf16>
    %c0_1 = arith.constant 0 : index
    %c0_2 = arith.constant 0 : index
    %2 = vector.load %arg2[%c0_1, %c0_2] : memref<8x64xbf16, #tpu.memory_space<vmem>>, vector<8x64xbf16>
    %cst = arith.constant dense<0.000000e+00> : vector<2x64xf32>
    %3 = tpu.matmul %1, %2, %cst {dimension_numbers = #tpu.dot_dimension_numbers<[1], [0], [0], [1], [0, 0, 1, 1], [], []>} : vector<2x8xbf16>, vector<8x64xbf16>, vector<2x64xf32> -> vector<2x64xf32>
    %c0_3 = arith.constant 0 : index
    %c0_4 = arith.constant 0 : index
    %4 = vector.load %arg3[%c0_3, %c0_4] : memref<1x64xf32, #tpu.memory_space<vmem>>, vector<1x64xf32>
    %5 = vector.broadcast %4 : vector<1x64xf32> to vector<2x64xf32>
    %6 = arith.addf %3, %5 : vector<2x64xf32>
    %7 = math.tanh %6 : vector<2x64xf32>
    %8 = arith.truncf %7 : vector<2x64xf32> to vector<2x64xbf16>
    %c0_5 = arith.constant 0 : index
    %c0_6 = arith.constant 0 : index
    %9 = vector.load %arg4[%c0_5, %c0_6] : memref<64x5xbf16, #tpu.memory_space<vmem>>, vector<64x5xbf16>
    %cst_7 = arith.constant dense<0.000000e+00> : vector<2x5xf32>
    %10 = tpu.matmul %8, %9, %cst_7 {dimension_numbers = #tpu.dot_dimension_numbers<[1], [0], [0], [1], [0, 0, 1, 1], [], []>} : vector<2x64xbf16>, vector<64x5xbf16>, vector<2x5xf32> -> vector<2x5xf32>
    %c0_8 = arith.constant 0 : index
    %c0_9 = arith.constant 0 : index
    %11 = vector.load %arg5[%c0_8, %c0_9] : memref<1x5xf32, #tpu.memory_space<vmem>>, vector<1x5xf32>
    %12 = vector.broadcast %11 : vector<1x5xf32> to vector<2x5xf32>
    %13 = arith.addf %10, %12 : vector<2x5xf32>
    %c0_10 = arith.constant 0 : index
    %c0_11 = arith.constant 0 : index
    %14 = vector.load %arg6[%c0_10, %c0_11] : memref<2x5xf32, #tpu.memory_space<vmem>>, vector<2x5xf32>
    tpu.vector_store %arg6[%c0_10, %c0_11], %13 {strides = array<i32>} : memref<2x5xf32, #tpu.memory_space<vmem>>, vector<2x5xf32>,
    return
  }
  func.func @transform_0(%arg0: i32) -> (i32, i32) {
    %c0_i32 = arith.constant 0 : i32
    %c0_i32_0 = arith.constant 0 : i32
    return %arg0, %c0_i32 : i32, i32
  }
  func.func @transform_1(%arg0: i32) -> (i32, i32) {
    %c0_i32 = arith.constant 0 : i32
    %c0_i32_0 = arith.constant 0 : i32
    %c0_i32_1 = arith.constant 0 : i32
    return %c0_i32, %c0_i32_0 : i32, i32
  }
  func.func @transform_2(%arg0: i32) -> (i32, i32) {
    %c0_i32 = arith.constant 0 : i32
    %c0_i32_0 = arith.constant 0 : i32
    %c0_i32_1 = arith.constant 0 : i32
    return %c0_i32, %c0_i32_0 : i32, i32
  }
  func.func @transform_3(%arg0: i32) -> (i32, i32) {
    %c0_i32 = arith.constant 0 : i32
    %c0_i32_0 = arith.constant 0 : i32
    %c0_i32_1 = arith.constant 0 : i32
    return %c0_i32, %c0_i32_0 : i32, i32
  }
  func.func @transform_4(%arg0: i32) -> (i32, i32) {
    %c0_i32 = arith.constant 0 : i32
    %c0_i32_0 = arith.constant 0 : i32
    %c0_i32_1 = arith.constant 0 : i32
    return %c0_i32, %c0_i32_0 : i32, i32
  }
  func.func @transform_5(%arg0: i32) -> (i32, i32) {
    %c0_i32 = arith.constant 0 : i32
    %c0_i32_0 = arith.constant 0 : i32
    return %arg0, %c0_i32 : i32, i32
  }
}

</mosaic_0001>

<bundles_post_ra>
// kernel: tpu_custom_call.1
= control target key start
LH: loop header
LB: loop body
LE: loop exit
PB: predicated region body
PF: predicated region fallthrough
CT: control target
= control target key end

     0   :  { %vm36_vm0 = vcmask 1043456   ;;  %v247_v1 = vmov 0.0   ;;  %vm248_vm1 = vmmov 0   ;;  %vm32_vm2 = vcmask 64512   ;;  %s316_s0 = inlined_call_operand.vmem [shape: f32[2,8], index: 0, kind: input, shape index: {}]   ;;  %s317_s1 = inlined_call_operand.vmem [shape: bf16[8,64], index: 1, kind: input, shape index: {}]   ;;  %s318_s2 = inlined_call_operand.vmem [shape: f32[1,64], index: 2, kind: input, shape index: {}]   ;;  %s319_s3 = inlined_call_operand.vmem [shape: bf16[64,5], index: 3, kind: input, shape index: {}]   ;;  %s320_s4 = inlined_call_operand.vmem [shape: f32[1,5], index: 4, kind: input, shape index: {}]   ;;  %s321_s5 = inlined_call_operand.hbm [shape: f32[2,5], index: 5, kind: output, shape index: {}]  }
   0x1   :  { %v24_v0 = vld [vmem:[%s317_s1] sm:$0xf]  ;;  %196 = vmatprep.subr.bf16.mxu0 %v247_v1  ;;  %198 = vmatprep.mubr.msk.bf16.mxu0 %vm248_vm1, %v247_v1 }
   0x2   :  { %v38_v2 = vsel %vm36_vm0, %v24_v0, 0  ;;  %v22_v3 = vld [vmem:[%s316_s0] sm:$0x3]  ;;  %202 = vmatprep.subr.bf16.mxu1 %v247_v1  ;;  %210 = vmatprep.mubr.msk.bf16.mxu1 %vm248_vm1, %v247_v1 }
   0x3   :  { %197 = vmatpush3.bf16.msra.mxu0 %v38_v2  ;;  %v23_v4 = vpack.c.bf16 %v22_v3, %v22_v3 }
   0x4   :  { %10 = vsyncpa [#allocation3], 0  ;;  %v217_v5 = vld [vmem:[%s319_s3] sm:$0xff]   ;;  %v218_v6 = vld [vmem:[%s319_s3 + $0x8] sm:$0xff]   ;;  %vm121_vm3 = vcmask 523264   ;;  %vm165_vm4 = vcmask 33792  }
   0x5   :  { %203 = vmatpush3.bf16.msra.mxu1 %v217_v5  ;;  %v219_v7 = vld [vmem:[%s319_s3 + $0x10] sm:$0xff]   ;;  %v220_v8 = vld [vmem:[%s319_s3 + $0x18] sm:$0xff]   ;;  %v181_v9 = vld [vmem:[%s318_s2] ss:$0 sm:$0xff]  ;;  %s249_s3 = smov [#allocation2]  }
   0x6   :  { %199 = vmatmul.mubr.msk.bf16.vlgmr.msra.gmra.mrb[0].mxu0 %vm32_vm2, %v23_v4  ;;  %204 = vmatprep.subr.bf16.mxu1 %v247_v1  ;;  %v183_v17 = vld [vmem:[%s320_s4] ss:$0 sm:$0xff]  ;;  %s173_s7 = sshll.u32 %s249_s3, 4  ;;  %s174_s7 = int_to_ptr.vmem [resolvable:$true] %s173_s7 }
   0x7   :  { %s223_s2 = scalar_lea.vmem %s174_s7, 32  ;;  %p228_p1 = scmp.lt.s32.totalorder %s174_s7, %s174_s7 }
   0x8   :  { %p224_p0 = scmp.ne.s32.totalorder %s174_s7, %s223_s2  ;;  %p229_p2 = scmp.lt.s32.totalorder %s223_s2, %s223_s2 }
   0x9   :  { %205 = vmatpush3.bf16.msra.mxu1 %v218_v6 }
   0xa   :  { %206 = vmatprep.subr.bf16.mxu1 %v247_v1  ;;  %p230_p3 = por %p229_p2, %p228_p1 }
   0xc   :  { %p231_p4 = pnand %p230_p3, %p224_p0 }
   0xd   :  { %207 = vmatpush3.bf16.msra.mxu1 %v219_v7 }
   0xe   :  { %208 = vmatprep.subr.bf16.mxu1 %v247_v1 }
  0x11   :  { %209 = vmatpush3.bf16.msra.mxu1 %v220_v8 }
  0xd9   :  { %v74_v10 = vpop.f32.mrb[0].mxu0 }
  0xda   :  { %v75_v11 = vadd.f32 %v181_v9, %v74_v10  ;;  %v200_v12 = vpop.f32.mrb[1].mxu0 }
  0xdb   :  { %v77_v13 = vpop.f32.mrb[2].mxu0 }
  0xdc   :  { %221 = vtanh.f32 %v75_v11  ;;  %v201_v14 = vpop.f32.mrb[3].mxu0 }
  0xe6   :  { %v222_v15 = vpop.eup %221 }
  0xe7   :  { %v81_v16 = vpack.c.bf16 %v222_v15, %v222_v15 }
  0xe9   :  { %211 = vmatmul.mubr.msk.bf16.vlgmr.msra.gmra.mrb[0].mxu1 %vm121_vm3, %v81_v16 }
 0x1bc   :  { %v159_v18 = vpop.f32.mrb[0].mxu1 }
 0x1bd   :  { %v160_v19 = vadd.f32 %v183_v17, %v159_v18  ;;  %v212_v20 = vpop.f32.mrb[1].mxu1 }
 0x1be   :  { %v162_v21 = vpop.f32.mrb[2].mxu1 }
 0x1bf   :  { %v213_v22 = vpop.f32.mrb[3].mxu1  ;;  %166 = vst.msk [vmem:[#allocation2] sm:$0x3] %vm165_vm4, %v160_v19 }
 0x1c0   :  { %234 = shalt.err (!%p231_p4)
}
 0x1c1   :  { %s235_s4 = scalar_lea.hbm %s321_s5, 32 }
 0x1c2   :  { %p236_p5 = scmp.ne.s32.totalorder %s321_s5, %s235_s4  ;;  %p239_p6 = scmp.lt.u32.totalorder %s235_s4, %s321_s5 }
 0x1c4   :  { %p241_p7 = pnand %p239_p6, %p236_p5 }
 0x1c6   :  { %244 = shalt.err (!%p241_p7)
}
 0x1c7   :  { %176 = dma.vmem_to_hbm [thread:$0]  %s174_s7, 32, %s321_s5, [#allocation3]  }
 0x1c8   :  { %245 = dma.done.wait [#allocation3], 32  }
 0x1c9   :  { %246 = vsyncadd [#allocation3], 4294967264 }
 0x1ca   :  { %180 = vsyncpa [#allocation3], 1 }

</bundles_post_ra>
